<compile_context>
chip_gen: v6e
topology: v6e:2x2x1
jax: 0.10.0
libtpu: 0.0.40
codegen_flags: <defaults>
</compile_context>

<pallas_src>
import jax
import jax.numpy as jnp
from jax.experimental import pallas as pl
from jax.experimental.pallas import tpu as pltpu


def _round_up(x: int, m: int) -> int:
    return ((x + m - 1) // m) * m


def _lanes(n: int) -> int:
    # Lane-padded width an array actually occupies in VMEM.
    return _round_up(max(n, 1), 128)


# --------------------------------------------------------------------------
# Kernels
# --------------------------------------------------------------------------

def _mlp_kernel_resident(x_ref, w1_ref, b1_ref, w2_ref, b2_ref, o_ref):
    """Whole weight matrices resident in VMEM; one streamed M tile per step."""
    a = jnp.dot(x_ref[...], w1_ref[...],
                preferred_element_type=jnp.float32) + b1_ref[...]
    z = jnp.tanh(a)                                            # EUP, f32
    logits = jnp.dot(z.astype(w2_ref.dtype), w2_ref[...],
                     preferred_element_type=jnp.float32) + b2_ref[...]
    o_ref[...] = logits.astype(o_ref.dtype)


def _mlp_kernel_htiled(x_ref, w1_ref, b1_ref, w2_ref, b2_ref, o_ref, acc_ref):
    """Fallback: hidden dim tiled on a grid axis, f32 accumulator in VMEM."""
    h = pl.program_id(1)

    @pl.when(h == 0)
    def _():
        acc_ref[...] = jnp.zeros_like(acc_ref)

    a = jnp.dot(x_ref[...], w1_ref[...],
                preferred_element_type=jnp.float32) + b1_ref[...]
    z = jnp.tanh(a)
    acc_ref[...] += jnp.dot(z.astype(w2_ref.dtype), w2_ref[...],
                            preferred_element_type=jnp.float32)

    @pl.when(h == pl.num_programs(1) - 1)
    def _():
        o_ref[...] = (acc_ref[...] + b2_ref[...]).astype(o_ref.dtype)


# --------------------------------------------------------------------------
# VMEM sizing helpers (generation-aware)
# --------------------------------------------------------------------------

def _vmem_capacity_bytes() -> int:
    cap = 64 * 1024 * 1024          # conservative default (v7x per-TC VMEM)
    try:
        info = pltpu.get_tpu_info()
        c = int(getattr(info, "vmem_capacity_bytes", 0))
        if c > 0:
            cap = c
    except Exception:
        pass
    return min(max(cap, 32 * 1024 * 1024), 256 * 1024 * 1024)


def _vmem_bytes_resident(tm, d_in, hp, c, act_b, w_b, out_b):
    dv, cv = _lanes(d_in), _lanes(c)
    return (2 * tm * dv * act_b              # streamed x tiles (double-buffered)
            + 2 * tm * cv * out_b            # streamed out tiles
            + (dv * hp + hp * cv) * w_b      # W1/W2 resident, single copy
            + (hp + cv) * 4                  # biases (f32)
            + tm * hp * 4 + tm * cv * 4)     # f32 temporaries


def _vmem_bytes_htiled(tm, th, d_in, c, act_b, w_b, out_b):
    dv, cv = _lanes(d_in), _lanes(c)
    return (2 * tm * dv * act_b
            + 2 * tm * cv * out_b
            + 2 * (dv * th + th * cv) * w_b  # streamed weight tiles
            + 2 * (th + cv) * 4
            + tm * cv * 4                    # f32 accumulator
            + tm * th * 4 + tm * cv * 4)     # f32 temporaries


def _vmem_limit(est: int, cap: int) -> int:
    # Generous headroom over the estimate, capped at ~75% of physical VMEM
    # (~48 MiB on v7x, ~96 MiB on v5e/v6e).
    return int(min(max(int(1.5 * est), 16 * 1024 * 1024), int(0.75 * cap)))


def _choose_tm(tm_req, m, fits):
    tm = min(_round_up(max(tm_req, 8), 8), _round_up(m, 8))
    while tm > 8 and not fits(tm):
        if tm > 512:
            tm -= 256          # keep MXU-friendly multiples while large
        elif tm > 128:
            tm -= 128
        else:
            tm = max(tm - 8, 8)
        tm = _round_up(tm, 8)
    return tm


# --------------------------------------------------------------------------
# Forward wrapper
# --------------------------------------------------------------------------

def mlp_forward(x, w1, b1, w2, b2, *, tm=512, use_bf16_matmul=False,
                hidden_tile=None):
    """x: (B, S, D_in); w1: (D_in, H); b1: (H,); w2: (H, C); b2: (C,).

    Returns logits of shape (B, S, C)."""
    B, S, D_in = x.shape
    H = w1.shape[1]
    C = w2.shape[1]
    M = B * S
    out_dtype = x.dtype

    # Only the hidden dim is padded (tiny weight/bias arrays); x and the
    # output are never padded/copied in HBM.
    Hp = _round_up(max(H, 1), 128)

    x2d = x.reshape(M, D_in)
    w1_p = jnp.pad(w1, ((0, 0), (0, Hp - H)))
    b1_p = jnp.pad(b1, (0, Hp - H)).reshape(1, Hp).astype(jnp.float32)
    w2_p = jnp.pad(w2, ((0, Hp - H), (0, 0)))
    b2_p = b2.reshape(1, C).astype(jnp.float32)

    if use_bf16_matmul:
        # bf16 MXU inputs (v6e/v7x); f32 accumulation + f32 epilogue in-kernel.
        x2d = x2d.astype(jnp.bfloat16)
        w1_p = w1_p.astype(jnp.bfloat16)
        w2_p = w2_p.astype(jnp.bfloat16)
    # TODO(synk): on v7x, fp8 weights (+ bf16 activations) would halve weight
    # VMEM/DMA again if accuracy allows; not implemented here.

    act_b = x2d.dtype.itemsize
    w_b = w1_p.dtype.itemsize
    out_b = jnp.dtype(out_dtype).itemsize

    cap = _vmem_capacity_bytes()
    budget = int(0.60 * cap)

    # Advisory cost estimate (same for both paths).
    flops = 2 * M * (D_in * Hp + Hp * C)
    bytes_accessed = (M * D_in * act_b + (D_in * Hp + Hp * C) * w_b
                      + (Hp + C) * 4 + M * C * out_b)
    cost = pl.CostEstimate(flops=flops, transcendentals=M * Hp,
                           bytes_accessed=bytes_accessed)

    # Choose path: resident weights (common) vs hidden-dim tiling (large H).
    use_htile = hidden_tile is not None
    if not use_htile:
        probe_tm = min(_round_up(M, 8), 128)
        if _vmem_bytes_resident(probe_tm, D_in, Hp, C, act_b, w_b, out_b) > budget:
            use_htile = True

    if not use_htile:
        # ---------------- Path A: weights fully resident in VMEM ----------
        def fits(t):
            return _vmem_bytes_resident(t, D_in, Hp, C, act_b, w_b, out_b) <= budget

        TM = _choose_tm(tm, M, fits)
        est = _vmem_bytes_resident(TM, D_in, Hp, C, act_b, w_b, out_b)
        grid = (pl.cdiv(M, TM),)

        # Whole-array VMEM operands: fetched once, single-buffered.
        resident = pl.BlockSpec(memory_space=pltpu.MemorySpace.VMEM)

        out2d = pl.pallas_call(
            _mlp_kernel_resident,
            out_shape=jax.ShapeDtypeStruct((M, C), out_dtype),
            grid_spec=pl.GridSpec(
                grid=grid,
                in_specs=[
                    pl.BlockSpec((TM, D_in), lambda i: (i, 0)),  # streamed x
                    resident,                                    # W1
                    resident,                                    # b1
                    resident,                                    # W2
                    resident,                                    # b2
                ],
                out_specs=pl.BlockSpec((TM, C), lambda i: (i, 0)),
            ),
            compiler_params=pltpu.CompilerParams(
                dimension_semantics=("parallel",),
                vmem_limit_bytes=_vmem_limit(est, cap),
            ),
            cost_estimate=cost,
        )(x2d, w1_p, b1_p, w2_p, b2_p)
    else:
        # ---------------- Path B: hidden dim tiled + accumulator ----------
        if hidden_tile is not None:
            TH = max(128, _round_up(min(int(hidden_tile), Hp), 128))
            if Hp % TH != 0:
                TH = 128
        else:
            TH = 128
            for cand in (1024, 512, 256, 128):
                if Hp % cand == 0 and _vmem_bytes_htiled(
                        128, cand, D_in, C, act_b, w_b, out_b) <= budget:
                    TH = cand
                    break

        def fits(t):
            return _vmem_bytes_htiled(t, TH, D_in, C, act_b, w_b, out_b) <= budget

        TM = _choose_tm(tm, M, fits)
        est = _vmem_bytes_htiled(TM, TH, D_in, C, act_b, w_b, out_b)
        grid = (pl.cdiv(M, TM), Hp // TH)

        out2d = pl.pallas_call(
            _mlp_kernel_htiled,
            out_shape=jax.ShapeDtypeStruct((M, C), out_dtype),
            grid_spec=pltpu.PrefetchScalarGridSpec(
                num_scalar_prefetch=0,
                grid=grid,
                in_specs=[
                    pl.BlockSpec((TM, D_in), lambda i, h: (i, 0)),  # x tile
                    pl.BlockSpec((D_in, TH), lambda i, h: (0, h)),  # W1 tile
                    pl.BlockSpec((1, TH),    lambda i, h: (0, h)),  # b1 tile
                    pl.BlockSpec((TH, C),    lambda i, h: (h, 0)),  # W2 tile
                    pl.BlockSpec((1, C),     lambda i, h: (0, 0)),  # b2
                ],
                out_specs=pl.BlockSpec((TM, C), lambda i, h: (i, 0)),
                scratch_shapes=[pltpu.VMEM((TM, C), jnp.float32)],
            ),
            compiler_params=pltpu.CompilerParams(
                dimension_semantics=("parallel", "arbitrary"),
                vmem_limit_bytes=_vmem_limit(est, cap),
            ),
            cost_estimate=cost,
        )(x2d, w1_p, b1_p, w2_p, b2_p)

    return out2d.reshape(B, S, C)


def init_params(key, input_size, hidden_size, n_classes, dtype=jnp.float32):
    """Deterministic init mimicking nn.Linear default (uniform +/- 1/sqrt(fan_in))."""
    k1, k2, k3, k4 = jax.random.split(key, 4)
    bound1 = 1.0 / (input_size ** 0.5)
    bound2 = 1.0 / (hidden_size ** 0.5)
    # stored transposed relative to nn.Linear: (in, out)
    w1 = jax.random.uniform(k1, (input_size, hidden_size), dtype,
                            minval=-bound1, maxval=bound1)
    b1 = jax.random.uniform(k2, (hidden_size,), dtype,
                            minval=-bound1, maxval=bound1)
    w2 = jax.random.uniform(k3, (hidden_size, n_classes), dtype,
                            minval=-bound2, maxval=bound2)
    b2 = jax.random.uniform(k4, (n_classes,), dtype,
                            minval=-bound2, maxval=bound2)
    return w1, b1, w2, b2


if __name__ == "__main__":
    key = jax.random.PRNGKey(0)

    # ---- Config 1: toy pos_tagger sizes, f32, resident-weight path -------
    B, S = 2, 8                     # batch, max_seq_len
    input_size, hidden_size, n_classes = 32, 32, 16
    kx, kp = jax.random.split(key)
    x = jax.random.normal(kx, (B, S, input_size), jnp.float32)
    w1, b1, w2, b2 = init_params(kp, input_size, hidden_size, n_classes)
    ref = jnp.tanh(x @ w1 + b1) @ w2 + b2

    # tm=8 at toy sizes exercises the multi-tile (grid > 1) path.
    logits = jax.block_until_ready(mlp_forward(x, w1, b1, w2, b2, tm=8))
    assert logits.shape == (B, S, n_classes)
    assert jnp.allclose(logits, ref, atol=1e-5, rtol=1e-5)

    # ---- Config 1 with bf16 MXU inputs (production default on v6e/v7x) ---
    logits_bf16 = jax.block_until_ready(
        mlp_forward(x, w1, b1, w2, b2, tm=8, use_bf16_matmul=True))
    assert jnp.allclose(logits_bf16, ref, atol=5e-2, rtol=5e-2)

    # ---- Config 2: larger hidden dim; force the hidden-tiled fallback ----
    input_size2, hidden_size2, n_classes2 = 48, 256, 10
    kx2, kp2 = jax.random.split(kp)
    x2 = jax.random.normal(kx2, (B, S, input_size2), jnp.float32)
    w1b, b1b, w2b, b2b = init_params(kp2, input_size2, hidden_size2, n_classes2)
    ref2 = jnp.tanh(x2 @ w1b + b1b) @ w2b + b2b
    logits2 = jax.block_until_ready(
        mlp_forward(x2, w1b, b1b, w2b, b2b, tm=8, hidden_tile=128))
    assert logits2.shape == (B, S, n_classes2)
    assert jnp.allclose(logits2, ref2, atol=1e-5, rtol=1e-5)

    print("KERNEL_OK")
</pallas_src>

<mosaic_0001>
module attributes {stable_mosaic.version = 11 : i64} {
  func.func @_mlp_kernel_resident(%arg0: i32, %arg1: memref<8x32xf32, #tpu.memory_space<vmem>>, %arg2: memref<32x128xf32, #tpu.memory_space<vmem>>, %arg3: memref<1x128xf32, #tpu.memory_space<vmem>>, %arg4: memref<128x16xf32, #tpu.memory_space<vmem>>, %arg5: memref<1x16xf32, #tpu.memory_space<vmem>>, %arg6: memref<8x16xf32, #tpu.memory_space<vmem>>) attributes {dimension_semantics = [#tpu.dimension_semantics<parallel>], iteration_bounds = array<i64: 2>, scalar_prefetch = 0 : i64, scratch_operands = 0 : i64, tpu.core_type = #tpu.core_type<tc>, window_params = [{transform_indices = @transform_0, window_bounds = array<i64: 8, 32>}, {pipeline_mode = #tpu.pipeline_mode<synchronous>, transform_indices = @transform_1, window_bounds = array<i64: 32, 128>}, {pipeline_mode = #tpu.pipeline_mode<synchronous>, transform_indices = @transform_2, window_bounds = array<i64: 1, 128>}, {pipeline_mode = #tpu.pipeline_mode<synchronous>, transform_indices = @transform_3, window_bounds = array<i64: 128, 16>}, {pipeline_mode = #tpu.pipeline_mode<synchronous>, transform_indices = @transform_4, window_bounds = array<i64: 1, 16>}, {transform_indices = @transform_5, window_bounds = array<i64: 8, 16>}]} {
    %c0 = arith.constant 0 : index
    %c0_0 = arith.constant 0 : index
    %0 = vector.load %arg1[%c0, %c0_0] : memref<8x32xf32, #tpu.memory_space<vmem>>, vector<8x32xf32>
    %c0_1 = arith.constant 0 : index
    %c0_2 = arith.constant 0 : index
    %1 = vector.load %arg2[%c0_1, %c0_2] : memref<32x128xf32, #tpu.memory_space<vmem>>, vector<32x128xf32>
    %cst = arith.constant dense<0.000000e+00> : vector<8x128xf32>
    %2 = tpu.matmul %0, %1, %cst {dimension_numbers = #tpu.dot_dimension_numbers<[1], [0], [0], [1], [0, 0, 1, 1], [], []>} : vector<8x32xf32>, vector<32x128xf32>, vector<8x128xf32> -> vector<8x128xf32>
    %c0_3 = arith.constant 0 : index
    %c0_4 = arith.constant 0 : index
    %3 = vector.load %arg3[%c0_3, %c0_4] : memref<1x128xf32, #tpu.memory_space<vmem>>, vector<1x128xf32>
    %4 = vector.broadcast %3 : vector<1x128xf32> to vector<8x128xf32>
    %5 = arith.addf %2, %4 : vector<8x128xf32>
    %6 = math.tanh %5 : vector<8x128xf32>
    %c0_5 = arith.constant 0 : index
    %c0_6 = arith.constant 0 : index
    %7 = vector.load %arg4[%c0_5, %c0_6] : memref<128x16xf32, #tpu.memory_space<vmem>>, vector<128x16xf32>
    %cst_7 = arith.constant dense<0.000000e+00> : vector<8x16xf32>
    %8 = tpu.matmul %6, %7, %cst_7 {dimension_numbers = #tpu.dot_dimension_numbers<[1], [0], [0], [1], [0, 0, 1, 1], [], []>} : vector<8x128xf32>, vector<128x16xf32>, vector<8x16xf32> -> vector<8x16xf32>
    %c0_8 = arith.constant 0 : index
    %c0_9 = arith.constant 0 : index
    %9 = vector.load %arg5[%c0_8, %c0_9] : memref<1x16xf32, #tpu.memory_space<vmem>>, vector<1x16xf32>
    %10 = vector.broadcast %9 : vector<1x16xf32> to vector<8x16xf32>
    %11 = arith.addf %8, %10 : vector<8x16xf32>
    %c0_10 = arith.constant 0 : index
    %c0_11 = arith.constant 0 : index
    %12 = vector.load %arg6[%c0_10, %c0_11] : memref<8x16xf32, #tpu.memory_space<vmem>>, vector<8x16xf32>
    tpu.vector_store %arg6[%c0_10, %c0_11], %11 {strides = array<i32>} : memref<8x16xf32, #tpu.memory_space<vmem>>, vector<8x16xf32>,
    return
  }
  func.func @transform_0(%arg0: i32) -> (i32, i32) {
    %c0_i32 = arith.constant 0 : i32
    %c0_i32_0 = arith.constant 0 : i32
    return %arg0, %c0_i32 : i32, i32
  }
  func.func @transform_1(%arg0: i32) -> (i32, i32) {
    %c0_i32 = arith.constant 0 : i32
    %c0_i32_0 = arith.constant 0 : i32
    %c0_i32_1 = arith.constant 0 : i32
    return %c0_i32, %c0_i32_0 : i32, i32
  }
  func.func @transform_2(%arg0: i32) -> (i32, i32) {
    %c0_i32 = arith.constant 0 : i32
    %c0_i32_0 = arith.constant 0 : i32
    %c0_i32_1 = arith.constant 0 : i32
    return %c0_i32, %c0_i32_0 : i32, i32
  }
  func.func @transform_3(%arg0: i32) -> (i32, i32) {
    %c0_i32 = arith.constant 0 : i32
    %c0_i32_0 = arith.constant 0 : i32
    %c0_i32_1 = arith.constant 0 : i32
    return %c0_i32, %c0_i32_0 : i32, i32
  }
  func.func @transform_4(%arg0: i32) -> (i32, i32) {
    %c0_i32 = arith.constant 0 : i32
    %c0_i32_0 = arith.constant 0 : i32
    %c0_i32_1 = arith.constant 0 : i32
    return %c0_i32, %c0_i32_0 : i32, i32
  }
  func.func @transform_5(%arg0: i32) -> (i32, i32) {
    %c0_i32 = arith.constant 0 : i32
    %c0_i32_0 = arith.constant 0 : i32
    return %arg0, %c0_i32 : i32, i32
  }
}

</mosaic_0001>

<bundles_post_ra>
// kernel: tpu_custom_call.1
= control target key start
LH: loop header
LB: loop body
LE: loop exit
PB: predicated region body
PF: predicated region fallthrough
CT: control target
= control target key end

     0   :  { %10 = vsyncpa [#allocation3], 0  ;;  %s877_s0 = inlined_call_operand.vmem [shape: f32[16,32], index: 0, kind: input, shape index: {}]   ;;  %s878_s1 = inlined_call_operand.vmem [shape: f32[32,128], index: 1, kind: input, shape index: {}]   ;;  %s879_s2 = inlined_call_operand.vmem [shape: f32[1,128], index: 2, kind: input, shape index: {}]   ;;  %s880_s3 = inlined_call_operand.vmem [shape: f32[128,16], index: 3, kind: input, shape index: {}]   ;;  %s881_s4 = inlined_call_operand.vmem [shape: f32[1,16], index: 4, kind: input, shape index: {}]   ;;  %s882_s5 = inlined_call_operand.hbm [shape: f32[16,16], index: 5, kind: output, shape index: {}]  }
   0x1   :  { %12 = vsyncpa [#allocation3 + $0x1], 0  ;;  %s694_s18 = smov 0   ;;  %s696_s19 = smov 0  }
   0x2   :  { %s698_s20 = smov 0   ;;  %s700_s21 = smov 0  }
   0x3 LB: > { %s715_s22 = sadd.s32 4294967295, %s659_s21   ;;  %s475_s23 = sadd.s32 4294967294, %s659_s21   ;;  %s659_s21 = sphi %s700_s21, %s888_s21   ;;  %s655_s20 = sphi %s698_s20, %s887_s20   ;;  %s651_s19 = sphi %s696_s19, %s886_s19   ;;  %s647_s18 = sphi %s694_s18, %s885_s18  }
   0x4   : > { %s719_s24 = sadd.s32 1, %s659_s21   ;;  %s135_s25 = sadd.s32 1, %s655_s20 }
   0x5   : > { %s132_s26 = ssub.s32 %s659_s21, %s719_s24  ;;  %p145_p0 = scmp.ne.s32.totalorder %s655_s20, %s651_s19 }
   0x6   : > { %p133_p1 = scmp.eq.s32.totalorder %s132_s26, 0  ;;  %p146_p2 = scmp.eq.s32.totalorder %s715_s22, 1 }
   0x7   : > { %p151_p3 = scmp.ne.s32.totalorder %s651_s19, %s647_s18  ;;  %p152_p4 = scmp.eq.s32.totalorder %s475_s23, 1 }
   0x8   : > { %s730_s27 = scalar_select %p133_p1, %s655_s20, %s135_s25  }
   0x9   : > { %p732_p5 = por %p146_p2, %p145_p0  ;;  %p736_p6 = por %p152_p4, %p151_p3 }
   0xa   : > { %p478_p7 = scmp.ge.s32.totalorder %s659_s21, 1  ;;  %p189_p8 = scmp.lt.s32.totalorder %s659_s21, 3 }
   0xc   : > { %p190_p9 = pnand %p478_p7, %p189_p8 }
   0xd   : > { %p216_p10 = scmp.lt.s32.totalorder (!%p190_p9), %s715_s22, 1  ;;  %s213_s26 = sand.u32 (!%p190_p9), 1, %s651_s19  }
   0xe   : > { %193 = sbr.rel (%p190_p9) target bundleno = 445 (0x1bd), region = 40  ;;  %s479_s30 = sshll.u32 (!%p190_p9), %s213_s26, 3 }
   0xf   : > { %s485_s8 = sshll.u32 (!%p190_p9), %s715_s22, 7  ;;  %s215_s9 = scalar_lea.vmem (!%p190_p9), [#allocation2], %s479_s30 }
  0x10   : > { %s416_s10 = sshll.u32 (!%p190_p9), %s215_s9, 4  ;;  %s842_s13 = scalar_lea.hbm (!%p190_p9), %s882_s5, %s485_s8  ;;  %s417_s10 = int_to_ptr.vmem [resolvable:$true] %s416_s10 }
  0x11   : > { %s403_s14 = scalar_lea.sflag (!%p190_p9), [#allocation3], %s213_s26  ;;  %s599_s15 = scalar_lea.vmem (!%p190_p9), %s417_s10, 128 }
  0x12   : > { %p600_p11 = scmp.ne.s32.totalorder (!%p190_p9), %s417_s10, %s599_s15 }
  0x13   : > { %v224_v0 = vld [vmem:[%s878_s1 + $0x18] sm:$0xff]  ;;  %v661_v1 = vmov 0.0   ;;  %v223_v2 = vld [vmem:[%s878_s1 + $0x10] sm:$0xff]  ;;  %vm662_vm0 = vmmov 0   ;;  %s217_s11 = scalar_select %p216_p10, %s715_s22, 1  ;;  %v222_v5 = vld [vmem:[%s878_s1 + $0x8] sm:$0xff] }
  0x14   : > { %510 = vmatprep.subr.mxu0 %v661_v1  ;;  %518 = vmatprep.mubr.msk.f32.mxu0 %vm662_vm0, %v661_v1  ;;  %v322_v3 = vld [vmem:[%s880_s3 + $0x78] sm:$0xff]  ;;  %v321_v4 = vld [vmem:[%s880_s3 + $0x70] sm:$0xff]  ;;  %v320_v6 = vld [vmem:[%s880_s3 + $0x68] sm:$0xff]  ;;  %vm232_vm1 = vcmask 261120   ;;  %vm400_vm2 = vcmask 130048   ;;  %p601_p12 = pnand %p600_p11, %p732_p5  ;;  %s663_s22 = smov [#allocation2]  }
  0x15   : > { %511 = vmatpush3.msra.mxu0 %v224_v0  ;;  %521 = vmatprep.subr.mxu1 %v661_v1  ;;  %s480_s16 = sshll.u32 %s217_s11, 3  ;;  %v221_v7 = vld [vmem:[%s878_s1] sm:$0xff]  ;;  %v318_v10 = vld [vmem:[%s880_s3 + $0x58] sm:$0xff]  ;;  %v317_v11 = vld [vmem:[%s880_s3 + $0x50] sm:$0xff] }
  0x16   : > { %512 = vmatprep.subr.mxu0 %v661_v1  ;;  %522 = vmatpush3.msra.mxu1 %v322_v3  ;;  %s219_s7 = scalar_lea.vmem %s877_s0, %s480_s16  ;;  %v319_v9 = vld [vmem:[%s880_s3 + $0x60] sm:$0xff]  ;;  %v316_v12 = vld [vmem:[%s880_s3 + $0x48] sm:$0xff]  ;;  %v314_v14 = vld [vmem:[%s880_s3 + $0x38] sm:$0xff]  ;;  %p602_p13 = pneg %p601_p12 }
  0x17   : > { %513 = vmatpush3.msra.mxu0 %v223_v2  ;;  %523 = vmatprep.subr.mxu1 %v661_v1  ;;  %v220_v8 = vld [vmem:[%s219_s7] sm:$0xff]  ;;  %v313_v15 = vld [vmem:[%s880_s3 + $0x30] sm:$0xff]  ;;  %v312_v16 = vld [vmem:[%s880_s3 + $0x28] sm:$0xff]  ;;  %s603_s16 = sshll.u32 %s663_s22, 4  ;;  %s604_s16 = int_to_ptr.vmem [resolvable:$false] %s603_s16 }
  0x18   : > { %514 = vmatprep.subr.mxu0 %v661_v1  ;;  %524 = vmatpush3.msra.mxu1 %v321_v4  ;;  %v315_v13 = vld [vmem:[%s880_s3 + $0x40] sm:$0xff]  ;;  %v310_v18 = vld [vmem:[%s880_s3 + $0x18] sm:$0xff]  ;;  %v309_v19 = vld [vmem:[%s880_s3 + $0x10] sm:$0xff]  ;;  %s605_s17 = scalar_lea.vmem %s604_s16, 256  ;;  %p606_p0 = scmp.lt.s32.totalorder %s417_s10, %s604_s16 }
  0x19   : > { %515 = vmatpush3.msra.mxu0 %v222_v5  ;;  %525 = vmatprep.subr.mxu1 %v661_v1  ;;  %v311_v17 = vld [vmem:[%s880_s3 + $0x20] sm:$0xff]  ;;  %v308_v20 = vld [vmem:[%s880_s3 + $0x8] sm:$0xff]  ;;  %p607_p1 = scmp.lt.s32.totalorder %s605_s17, %s599_s15 }
  0x1a   : > { %516 = vmatprep.subr.mxu0 %v661_v1  ;;  %526 = vmatpush3.msra.mxu1 %v320_v6  ;;  %v307_v21 = vld [vmem:[%s880_s3] sm:$0xff] }
  0x1b   : > { %517 = vmatpush3.msra.mxu0 %v221_v7  ;;  %527 = vmatprep.subr.mxu1 %v661_v1  ;;  %v481_v22 = vld [vmem:[%s879_s2] ss:$0 sm:$0xff]  ;;  %p608_p2 = por %p607_p1, %p606_p0 }
  0x1c   : > { %519 = vmatmul.mubr.msk.f32.vlgmr.msra.gmra.mxu0 %vm232_vm1, %v220_v8  ;;  %528 = vmatpush3.msra.mxu1 %v319_v9  ;;  %v483_v27 = vld [vmem:[%s881_s4] ss:$0 sm:$0xff] }
  0x1d   : > { %529 = vmatprep.subr.mxu1 %v661_v1  ;;  %553 = vmatprep.mubr.msk.f32.mxu1 %vm662_vm0, %v661_v1  ;;  %p609_p3 = pnand %p608_p2, %p602_p13 }
  0x1e   : > { %530 = vmatpush3.msra.mxu1 %v318_v10 }
  0x1f   : > { %531 = vmatprep.subr.mxu1 %v661_v1 }
  0x20   : > { %532 = vmatpush3.msra.mxu1 %v317_v11 }
  0x21   : > { %533 = vmatprep.subr.mxu1 %v661_v1 }
  0x22   : > { %534 = vmatpush3.msra.mxu1 %v316_v12 }
  0x23   : > { %535 = vmatprep.subr.mxu1 %v661_v1 }
  0x24   : > { %536 = vmatpush3.msra.mxu1 %v315_v13 }
  0x25   : > { %537 = vmatprep.subr.mxu1 %v661_v1 }
  0x26   : > { %538 = vmatpush3.msra.mxu1 %v314_v14 }
  0x27   : > { %539 = vmatprep.subr.mxu1 %v661_v1 }
  0x28   : > { %540 = vmatpush3.msra.mxu1 %v313_v15 }
  0x29   : > { %541 = vmatprep.subr.mxu1 %v661_v1 }
  0x2a   : > { %542 = vmatpush3.msra.mxu1 %v312_v16 }
  0x2b   : > { %543 = vmatprep.subr.mxu1 %v661_v1 }
  0x2c   : > { %544 = vmatpush3.msra.mxu1 %v311_v17 }
  0x2d   : > { %545 = vmatprep.subr.mxu1 %v661_v1 }
  0x2e   : > { %546 = vmatpush3.msra.mxu1 %v310_v18 }
  0x2f   : > { %547 = vmatprep.subr.mxu1 %v661_v1 }
  0x30   : > { %548 = vmatpush3.msra.mxu1 %v309_v19 }
  0x31   : > { %549 = vmatprep.subr.mxu1 %v661_v1 }
  0x32   : > { %550 = vmatpush3.msra.mxu1 %v308_v20 }
  0x33   : > { %551 = vmatprep.subr.mxu1 %v661_v1 }
  0x34   : > { %552 = vmatpush3.msra.mxu1 %v307_v21 }
  0xdc   : > { %v302_v23 = vpop.f32.mrf.mxu0 }
  0xdd   : > { %v303_v24 = vadd.f32 %v481_v22, %v302_v23 }
  0xde   : > { %v520_v25 = vpop.f32.mrf.mxu0 }
  0xdf   : > { %597 = vtanh.f32 %v303_v24 }
  0xec   : > { %v598_v26 = vpop.eup %597 }
  0xed   : > { %554 = vmatmul.mubr.f32.vlgmr.msra.gmra.mxu1 %v598_v26 }
 0x1ad   : > { %v396_v28 = vpop.f32.mrf.mxu1 }
 0x1ae   : > { %v397_v29 = vadd.f32 %v483_v27, %v396_v28 }
 0x1af   : > { %v555_v30 = vpop.f32.mrf.mxu1 }
 0x1b0   : > { %401 = vst.msk [vmem:[%s215_s9] sm:$0xff] %vm400_vm2, %v397_v29 }
 0x1b1   : > { %612 = shalt.err (!%p609_p3)
}
 0x1b2   : > { %s613_s23 = scalar_lea.hbm %s842_s13, 128  ;;  %s617_s30 = scalar_lea.hbm %s882_s5, 256 }
 0x1b3   : > { %p614_p4 = scmp.ne.s32.totalorder %s842_s13, %s613_s23  ;;  %p618_p9 = scmp.lt.s32.totalorder %s842_s13, %s882_s5 }
 0x1b4   : > { %p619_p10 = scmp.lt.s32.totalorder %s617_s30, %s613_s23 }
 0x1b5   : > { %p615_p7 = pnand %p614_p4, %p732_p5 }
 0x1b6   : > { %p620_p11 = por %p619_p10, %p618_p9 }
 0x1b7   : > { %p616_p8 = pneg %p615_p7 }
 0x1b9   : > { %p621_p12 = pnand %p620_p11, %p616_p8 }
 0x1bb   : > { %624 = shalt.err (!%p621_p12)
}
 0x1bc   : > { %556 = dma.vmem_to_hbm [thread:$0]  (%p732_p5), %s417_s10, 128, %s842_s13, %s403_s14  }
 0x1bd PF: > { %p562_p13 = scmp.ge.s32.totalorder %s659_s21, 2  ;;  %s428_s8 = sand.u32 1, %s647_s18  }
 0x1be   : > { %s429_s9 = scalar_lea.sflag [#allocation3], %s428_s8 }
 0x1bf   : > { %p559_p0 = pnand %p562_p13, %p736_p6 }
 0x1c1   : > { %p560_p1 = pneg %p559_p0 }
 0x1c3   : > { %642 = dma.done.wait (%p560_p1), %s429_s9, 128  }
 0x1c4   : > { %644 = vsyncadd (%p560_p1), %s429_s9, 4294967168  ;;  %p15_p2 = scmp.ge.s32.totalorder %s719_s24, 4   ;;  %s885_s18 = smov %s651_s19 }
 0x1c5   : > { %s886_s19 = smov %s655_s20  ;;  %s887_s20 = smov %s730_s27 }
 0x1c6   : > { %s888_s21 = smov %s719_s24  ;;  %17 = sbr.rel (!%p15_p2) target bundleno = 3 (0x3), region = 75 }
 0x1cb   :  { %434 = vsyncpa [#allocation3], 1 }
 0x1cc   :  { %436 = vsyncpa [#allocation3 + $0x1], 1 }

</bundles_post_ra>
